<compile_context>
chip_gen: v5e
topology: v5e:2x2
jax: 0.10.0
libtpu: 0.0.40
codegen_flags: <defaults>
</compile_context>

<pallas_src>
import functools

import jax
import jax.numpy as jnp
from jax.experimental import pallas as pl
from jax.experimental.pallas import tpu as pltpu

_LANE = 128
_SUBLANE = 8
_DEFAULT_BLOCK_ROWS = 2048  # 2048 x 128 f32 = 1 MiB per input block

# Sentinel pad for `returns`: larger than any real return, so `r <= var` is
# False on padding and no mask is needed anywhere.
_RET_PAD = float(jnp.finfo(jnp.float32).max)


def _cdiv(a, b):
    return -(-a // b)


def _layout(n, max_block_rows):
    """Return (total_rows, block_rows): rows multiple of block_rows, block_rows multiple of 8."""
    rows = max(_SUBLANE, _cdiv(n, _LANE))
    rows = _cdiv(rows, _SUBLANE) * _SUBLANE
    block_rows = min(int(max_block_rows), rows)
    block_rows = _cdiv(block_rows, _SUBLANE) * _SUBLANE
    rows = _cdiv(rows, block_rows) * block_rows
    return rows, block_rows


def _pad_2d(x_flat, rows, pad_value=0.0):
    # TODO(synk): for very large inputs this jnp.pad re-materializes the array
    # in HBM; a ragged-last-block (pl.BoundedSlice) variant would avoid it.
    n = x_flat.shape[0]
    total = rows * _LANE
    x_p = jnp.pad(x_flat, (0, total - n), constant_values=pad_value)
    return x_p.reshape(rows, _LANE)


# ----------------------------------------------------------------------------
# Kernels
# ----------------------------------------------------------------------------
def _huber_mean_kernel(yp_ref, yt_ref, out_ref, *, delta, inv_n):
    """Accumulates sum of elementwise huber losses into the resident (1,1) output."""
    @pl.when(pl.program_id(0) == 0)
    def _init():
        out_ref[...] = jnp.zeros_like(out_ref)

    diff = yp_ref[...] - yt_ref[...]
    absd = jnp.abs(diff)
    h = jnp.where(absd <= delta, 0.5 * diff * diff, delta * (absd - 0.5 * delta))
    out_ref[...] += jnp.sum(h).reshape(1, 1)

    @pl.when(pl.program_id(0) == pl.num_programs(0) - 1)
    def _finalize():
        out_ref[...] *= inv_n


def _cvar_penalty_kernel(var_ref, ret_ref, out_ref, sum_ref, cnt_ref):
    """Accumulates tail sum/count of returns <= VaR; writes -mean(tail) at the end."""
    @pl.when(pl.program_id(0) == 0)
    def _init():
        sum_ref[...] = jnp.zeros_like(sum_ref)
        cnt_ref[...] = jnp.zeros_like(cnt_ref)

    var = var_ref[0]
    r = ret_ref[...]
    in_tail = r <= var
    sum_ref[...] += jnp.sum(jnp.where(in_tail, r, 0.0)).reshape(1, 1)
    cnt_ref[...] += jnp.sum(in_tail.astype(jnp.float32)).reshape(1, 1)

    @pl.when(pl.program_id(0) == pl.num_programs(0) - 1)
    def _finalize():
        s = sum_ref[...]
        cnt = cnt_ref[...]
        out_ref[...] = jnp.where(cnt > 0.0, -s / jnp.maximum(cnt, 1.0),
                                 jnp.zeros_like(s))


# ----------------------------------------------------------------------------
# Wrappers
# ----------------------------------------------------------------------------
def _huber_mean(yp, yt, *, delta, max_block_rows):
    n = yp.shape[0]
    rows, block_rows = _layout(n, max_block_rows)
    grid = (rows // block_rows,)
    yp2d = _pad_2d(yp, rows, pad_value=0.0)   # zero pads contribute 0 to the sum
    yt2d = _pad_2d(yt, rows, pad_value=0.0)

    out = pl.pallas_call(
        functools.partial(_huber_mean_kernel, delta=float(delta),
                          inv_n=1.0 / float(n)),
        out_shape=jax.ShapeDtypeStruct((1, 1), jnp.float32),
        grid=grid,
        in_specs=[pl.BlockSpec((block_rows, _LANE), lambda i: (i, 0)),
                  pl.BlockSpec((block_rows, _LANE), lambda i: (i, 0))],
        out_specs=pl.BlockSpec((1, 1), lambda i: (0, 0)),
        compiler_params=pltpu.CompilerParams(
            dimension_semantics=("arbitrary",)),
    )(yp2d, yt2d)
    return out[0, 0]


def _cvar_penalty(r1d, var, *, max_block_rows):
    n = r1d.shape[0]
    rows, block_rows = _layout(n, max_block_rows)
    grid = (rows // block_rows,)
    r2d = _pad_2d(r1d, rows, pad_value=_RET_PAD)
    var_arr = jnp.reshape(var.astype(jnp.float32), (1,))

    out = pl.pallas_call(
        _cvar_penalty_kernel,
        out_shape=jax.ShapeDtypeStruct((1, 1), jnp.float32),
        grid_spec=pltpu.PrefetchScalarGridSpec(
            num_scalar_prefetch=1,
            grid=grid,
            in_specs=[pl.BlockSpec((block_rows, _LANE), lambda i, v: (i, 0))],
            out_specs=pl.BlockSpec((1, 1), lambda i, v: (0, 0)),
            scratch_shapes=[pltpu.VMEM((1, 1), jnp.float32),   # tail sum
                            pltpu.VMEM((1, 1), jnp.float32)],  # tail count
        ),
        compiler_params=pltpu.CompilerParams(
            dimension_semantics=("arbitrary",)),
    )(var_arr, r2d)
    return out[0, 0]


def robust_loss(y_pred, y_true, returns=None, *, alpha=0.05, delta=1.0,
                max_block_rows=_DEFAULT_BLOCK_ROWS):
    yp = jnp.asarray(y_pred, jnp.float32).reshape(-1)
    yt = jnp.asarray(y_true, jnp.float32).reshape(-1)
    if yp.shape[0] == 0 or yt.shape[0] == 0:
        raise ValueError("robust_loss requires non-empty y_pred / y_true")
    if yp.shape != yt.shape:
        raise ValueError("y_pred and y_true must have the same number of elements")

    huber = _huber_mean(yp, yt, delta=delta, max_block_rows=max_block_rows)

    # Statically specialized no-returns path: huber-only, no dummy DMA.
    if returns is None:
        return huber
    r1d = jnp.squeeze(jnp.asarray(returns, jnp.float32))
    if r1d.ndim == 0:
        r1d = r1d[None]
    r1d = r1d.reshape(-1)
    if r1d.shape[0] == 0:
        return huber

    # TODO(synk): torch.quantile is a sort + linear interpolation; no clean
    # Pallas sort primitive, so the VaR scalar is computed in plain JAX (for
    # large `returns` this O(N log N) sort, not the kernel, dominates).
    var = jnp.quantile(r1d, alpha).astype(jnp.float32)
    cvar = _cvar_penalty(r1d, var, max_block_rows=max_block_rows)
    return huber + 0.5 * cvar


# ----------------------------------------------------------------------------
# Pure-JAX reference mirroring the PyTorch module
# ----------------------------------------------------------------------------
def _reference_robust_loss(y_pred, y_true, returns=None, alpha=0.05, delta=1.0):
    diff = jnp.asarray(y_pred, jnp.float32).reshape(-1) - \
        jnp.asarray(y_true, jnp.float32).reshape(-1)
    absd = jnp.abs(diff)
    h = jnp.where(absd <= delta, 0.5 * diff * diff, delta * (absd - 0.5 * delta))
    huber = jnp.mean(h)
    if returns is None or returns.size == 0:
        return huber
    r = jnp.squeeze(jnp.asarray(returns, jnp.float32)).reshape(-1)
    var = jnp.quantile(r, alpha)
    mask = r <= var
    tail_sum = jnp.sum(jnp.where(mask, r, 0.0))
    tail_cnt = jnp.sum(mask.astype(jnp.float32))
    cvar = jnp.where(tail_cnt > 0.0, -tail_sum / jnp.maximum(tail_cnt, 1.0), 0.0)
    return huber + 0.5 * cvar


if __name__ == "__main__":
    key = jax.random.PRNGKey(0)
    k1, k2, k3, k4, k5, k6 = jax.random.split(key, 6)

    # Small demo matching the training-loop usage: (batch, 1) predictions.
    batch = 16
    y_pred = jax.random.normal(k1, (batch, 1), dtype=jnp.float32)
    y_true = jax.random.normal(k2, (batch, 1), dtype=jnp.float32)
    returns = 0.05 * jax.random.normal(k3, (batch, 1), dtype=jnp.float32)

    out = jax.block_until_ready(robust_loss(y_pred, y_true, returns,
                                            alpha=0.05, delta=1.0))
    ref = _reference_robust_loss(y_pred, y_true, returns, alpha=0.05, delta=1.0)
    assert jnp.allclose(out, ref, rtol=1e-5, atol=1e-6), (out, ref)

    # returns=None path (statically specialized huber-only kernel).
    out2 = jax.block_until_ready(robust_loss(y_pred, y_true, None))
    ref2 = _reference_robust_loss(y_pred, y_true, None)
    assert jnp.allclose(out2, ref2, rtol=1e-5, atol=1e-6), (out2, ref2)

    # Multi-block grid path (force >1 grid step via a small block size).
    n_big = 2000
    y_pred_b = jax.random.normal(k4, (n_big, 1), dtype=jnp.float32)
    y_true_b = jax.random.normal(k5, (n_big, 1), dtype=jnp.float32)
    returns_b = 0.05 * jax.random.normal(k6, (n_big, 1), dtype=jnp.float32)
    out3 = jax.block_until_ready(
        robust_loss(y_pred_b, y_true_b, returns_b, max_block_rows=8))
    ref3 = _reference_robust_loss(y_pred_b, y_true_b, returns_b)
    assert jnp.allclose(out3, ref3, rtol=1e-4, atol=1e-5), (out3, ref3)

    print("KERNEL_OK")
</pallas_src>

<mosaic_0001>
module attributes {stable_mosaic.version = 11 : i64} {
  func.func @_huber_mean_kernel(%arg0: i32, %arg1: memref<8x128xf32, #tpu.memory_space<vmem>>, %arg2: memref<8x128xf32, #tpu.memory_space<vmem>>, %arg3: memref<1x1xf32, #tpu.memory_space<vmem>>) attributes {dimension_semantics = [#tpu.dimension_semantics<arbitrary>], iteration_bounds = array<i64: 1>, scalar_prefetch = 0 : i64, scratch_operands = 0 : i64, tpu.core_type = #tpu.core_type<tc>, window_params = [{transform_indices = @transform_0, window_bounds = array<i64: 8, 128>}, {transform_indices = @transform_1, window_bounds = array<i64: 8, 128>}, {pipeline_mode = #tpu.pipeline_mode<synchronous>, transform_indices = @transform_2, window_bounds = array<i64: 1, 1>}]} {
    %c0_i32 = arith.constant 0 : i32
    %0 = arith.cmpi eq, %arg0, %c0_i32 : i32
    %1 = arith.extui %0 : i1 to i32
    %c0_i32_0 = arith.constant 0 : i32
    %2 = arith.cmpi ne, %1, %c0_i32_0 : i32
    scf.if %2 {
      %cst_14 = arith.constant 0.000000e+00 : f32
      %28 = vector.broadcast %cst_14 : f32 to vector<1x1xf32>
      %c0_15 = arith.constant 0 : index
      %c0_16 = arith.constant 0 : index
      %29 = vector.load %arg3[%c0_15, %c0_16] : memref<1x1xf32, #tpu.memory_space<vmem>>, vector<1x1xf32>
      tpu.vector_store %arg3[%c0_15, %c0_16], %28 {strides = array<i32>} : memref<1x1xf32, #tpu.memory_space<vmem>>, vector<1x1xf32>,
    } else {
    }
    %c0 = arith.constant 0 : index
    %c0_1 = arith.constant 0 : index
    %3 = vector.load %arg1[%c0, %c0_1] : memref<8x128xf32, #tpu.memory_space<vmem>>, vector<8x128xf32>
    %c0_2 = arith.constant 0 : index
    %c0_3 = arith.constant 0 : index
    %4 = vector.load %arg2[%c0_2, %c0_3] : memref<8x128xf32, #tpu.memory_space<vmem>>, vector<8x128xf32>
    %5 = arith.subf %3, %4 : vector<8x128xf32>
    %6 = math.absf %5 : vector<8x128xf32>
    %cst = arith.constant 1.000000e+00 : f32
    %7 = vector.broadcast %cst : f32 to vector<8x128xf32>
    %8 = arith.cmpf ole, %6, %7 : vector<8x128xf32>
    %cst_4 = arith.constant 5.000000e-01 : f32
    %9 = vector.broadcast %cst_4 : f32 to vector<8x128xf32>
    %10 = arith.mulf %9, %5 : vector<8x128xf32>
    %11 = arith.mulf %10, %5 : vector<8x128xf32>
    %cst_5 = arith.constant 5.000000e-01 : f32
    %12 = vector.broadcast %cst_5 : f32 to vector<8x128xf32>
    %13 = arith.subf %6, %12 : vector<8x128xf32>
    %cst_6 = arith.constant 1.000000e+00 : f32
    %14 = vector.broadcast %cst_6 : f32 to vector<8x128xf32>
    %15 = arith.mulf %14, %13 : vector<8x128xf32>
    %16 = arith.select %8, %11, %15 : vector<8x128xi1>, vector<8x128xf32>
    %c0_7 = arith.constant 0 : index
    %c0_8 = arith.constant 0 : index
    %17 = vector.load %arg3[%c0_7, %c0_8] : memref<1x1xf32, #tpu.memory_space<vmem>>, vector<1x1xf32>
    %18 = vector.shape_cast %16 : vector<8x128xf32> to vector<1x8x128xf32>
    %cst_9 = arith.constant dense<0.000000e+00> : vector<1xf32>
    %19 = vector.multi_reduction <add>, %18, %cst_9 [1, 2] : vector<1x8x128xf32> to vector<1xf32>
    %20 = vector.shape_cast %19 : vector<1xf32> to vector<1x1x1xf32>
    %21 = vector.extract %20[0, 0, 0] : f32 from vector<1x1x1xf32>
    %22 = vector.broadcast %21 : f32 to vector<1x1xf32>
    %23 = arith.addf %17, %22 : vector<1x1xf32>
    %c0_10 = arith.constant 0 : index
    %c0_11 = arith.constant 0 : index
    %24 = vector.load %arg3[%c0_10, %c0_11] : memref<1x1xf32, #tpu.memory_space<vmem>>, vector<1x1xf32>
    tpu.vector_store %arg3[%c0_10, %c0_11], %23 {strides = array<i32>} : memref<1x1xf32, #tpu.memory_space<vmem>>, vector<1x1xf32>,
    %c0_i32_12 = arith.constant 0 : i32
    %25 = arith.cmpi eq, %arg0, %c0_i32_12 : i32
    %26 = arith.extui %25 : i1 to i32
    %c0_i32_13 = arith.constant 0 : i32
    %27 = arith.cmpi ne, %26, %c0_i32_13 : i32
    scf.if %27 {
      %c0_14 = arith.constant 0 : index
      %c0_15 = arith.constant 0 : index
      %28 = vector.load %arg3[%c0_14, %c0_15] : memref<1x1xf32, #tpu.memory_space<vmem>>, vector<1x1xf32>
      %cst_16 = arith.constant 6.250000e-02 : f32
      %29 = vector.broadcast %cst_16 : f32 to vector<1x1xf32>
      %30 = arith.mulf %28, %29 : vector<1x1xf32>
      %c0_17 = arith.constant 0 : index
      %c0_18 = arith.constant 0 : index
      %31 = vector.load %arg3[%c0_17, %c0_18] : memref<1x1xf32, #tpu.memory_space<vmem>>, vector<1x1xf32>
      tpu.vector_store %arg3[%c0_17, %c0_18], %30 {strides = array<i32>} : memref<1x1xf32, #tpu.memory_space<vmem>>, vector<1x1xf32>,
    } else {
    }
    return
  }
  func.func @transform_0(%arg0: i32) -> (i32, i32) {
    %c0_i32 = arith.constant 0 : i32
    %c0_i32_0 = arith.constant 0 : i32
    return %arg0, %c0_i32 : i32, i32
  }
  func.func @transform_1(%arg0: i32) -> (i32, i32) {
    %c0_i32 = arith.constant 0 : i32
    %c0_i32_0 = arith.constant 0 : i32
    return %arg0, %c0_i32 : i32, i32
  }
  func.func @transform_2(%arg0: i32) -> (i32, i32) {
    %c0_i32 = arith.constant 0 : i32
    %c0_i32_0 = arith.constant 0 : i32
    %c0_i32_1 = arith.constant 0 : i32
    return %c0_i32, %c0_i32_0 : i32, i32
  }
}

</mosaic_0001>

<bundles_post_ra>
// kernel: tpu_custom_call.1
= control target key start
LH: loop header
LB: loop body
LE: loop exit
PB: predicated region body
PF: predicated region fallthrough
CT: control target
= control target key end

     0   :  { %7 = vsyncpa [#allocation3], 0  ;;  %s209_s0 = inlined_call_operand.hbm [shape: f32[8,128], index: 0, kind: input, shape index: {}]   ;;  %s210_s1 = inlined_call_operand.hbm [shape: f32[8,128], index: 1, kind: input, shape index: {}]   ;;  %s211_s2 = inlined_call_operand.hbm [shape: f32[1,1], index: 2, kind: output, shape index: {}]  }
   0x1   :  { %8 = vsyncpa [#allocation6], 0 }
   0x2   :  { %9 = vsyncpa [#allocation4], 0  ;;  %s15_s11 = sshll.u32 %s209_s0, 4  ;;  %s178_s12 = smov [#allocation2]   ;;  %s16_s11 = int_to_ptr.hbm [resolvable:$true] %s15_s11 }
   0x3   :  { %s17_s13 = sshll.u32 %s178_s12, 4  ;;  %s26_s16 = sshll.u32 %s210_s1, 4  ;;  %s18_s13 = int_to_ptr.vmem [resolvable:$true] %s17_s13  ;;  %s27_s16 = int_to_ptr.hbm [resolvable:$true] %s26_s16 }
   0x4   :  { %20 = dma.hbm_to_vmem [thread:$0]  %s16_s11, 128, %s18_s13, [#allocation3]  }
   0x5   :  { %s179_s17 = smov [#allocation5]  }
   0x6   :  { %s28_s18 = sshll.u32 %s179_s17, 4  ;;  %s29_s18 = int_to_ptr.vmem [resolvable:$true] %s28_s18 }
   0x7   :  { %31 = dma.hbm_to_vmem [thread:$0]  %s27_s16, 128, %s29_s18, [#allocation6]  }
   0x8   :  { %172 = dma.done.wait [#allocation3], 128  }
   0x9   :  { %173 = vsyncadd [#allocation3], 4294967168 }
   0xa   :  { %174 = dma.done.wait [#allocation6], 128  }
   0xb   :  { %175 = vsyncadd [#allocation6], 4294967168  ;;  %v46_v0 = vld [vmem:[#allocation2] sm:$0xff]  ;;  %v47_v1 = vld [vmem:[#allocation5] sm:$0xff]  ;;  %vm44_vm1 = vcmask 0   ;;  %v180_v8 = vmov 0.0  }
   0xc   :  { %v48_v2 = vsub.f32 %v46_v0, %v47_v1  ;;  %45 = vst.msk [vmem:[#allocation7] sm:$0x1] %vm44_vm1, %v180_v8  ;;  %s181_s1 = smov [#allocation7]   ;;  %s82_s22 = sshll.u32 %s211_s2, 4  ;;  %s83_s22 = int_to_ptr.hbm [resolvable:$true] %s82_s22 }
   0xd   :  { %s80_s19 = sshll.u32 %s181_s1, 4  ;;  %s81_s19 = int_to_ptr.vmem [resolvable:$true] %s80_s19 }
   0xe   :  { %v49_v3 = vand.u32 2147483647, %v48_v2  ;;  %v51_v4 = vmul.f32 0.5, %v48_v2 }
  0x10   :  { %vm50_vm0 = vcmp.le.f32.partialorder %v49_v3, 1.0  ;;  %v52_v5 = vmul.f32 %v51_v4, %v48_v2  ;;  %v93_v6 = vadd.f32 -0.5, %v49_v3 }
  0x12   :  { %v54_v7 = vsel %vm50_vm0, %v52_v5, %v93_v6 }
  0x13   :  { %56 = vadd.xlane.f32.xlu0 %v54_v7  ;;  %v55_v16 = vld [vmem:[#allocation7] sm:$0x1] }
  0x86   :  { %v57_v9 = vpop.xlane.xlu0 %56 }
  0x87   :  { %v58_v10 = vrot.slane %v57_v9, 4 }
  0x89   :  { %v59_v11 = vadd.f32 %v58_v10, %v57_v9 }
  0x8b   :  { %v60_v12 = vrot.slane %v59_v11, 2 }
  0x8d   :  { %v61_v13 = vadd.f32 %v60_v12, %v59_v11 }
  0x8f   :  { %v62_v14 = vrot.slane %v61_v13, 1 }
  0x91   :  { %v63_v15 = vadd.f32 %v62_v14, %v61_v13 }
  0x93   :  { %94 = vpush %v63_v15 }
  0xc4   :  { %s95_s0 = spop %94 }
  0xc5   :  { %v65_v17 = vstv %s95_s0 }
  0xc6   :  { %v66_v18 = vadd.f32 %v65_v17, %v55_v16 }
  0xc8   :  { %68 = vst.msk [vmem:[#allocation7] sm:$0x1] %vm44_vm1, %v66_v18 }
  0xcf   :  { %v72_v19 = vld [vmem:[#allocation7] sm:$0x1] }
  0xd0   :  { %v73_v20 = vmul.f32 0.0625, %v72_v19 }
  0xd2   :  { %74 = vst.msk [vmem:[#allocation7] sm:$0x1] %vm44_vm1, %v73_v20 }
  0xd3   :  { %85 = dma.vmem_to_hbm [thread:$0]  %s81_s19, 16, %s83_s22, [#allocation4]  }
  0xd4   :  { %176 = dma.done.wait [#allocation4], 16  }
  0xd5   :  { %177 = vsyncadd [#allocation4], 4294967280 }
  0xd6   :  { %90 = vsyncpa [#allocation3], 1 }
  0xd7   :  { %91 = vsyncpa [#allocation6], 1 }
  0xd8   :  { %92 = vsyncpa [#allocation4], 1 }

</bundles_post_ra>
